<compile_context>
chip_gen: v5e
topology: v5e:2x2
jax: 0.10.0
libtpu: 0.0.40
codegen_flags: <defaults>
</compile_context>

<pallas_src>
import math

import jax
import jax.numpy as jnp
from jax.experimental import pallas as pl
from jax.experimental.pallas import tpu as pltpu


_LANE = 128
_SUBLANE = 8
_VMEM_LIMIT_BYTES = 48 * 1024 * 1024   # requested scoped VMEM (< v7x 64 MiB)
_VMEM_TILE_BUDGET = 32 * 1024 * 1024   # what the tile plan is allowed to use
_MAX_BLOCK_ROWS = 4096                 # packed rows per grid step (clamp)


def _round_up(a: int, b: int) -> int:
    return (a + b - 1) // b * b


def _erf_approx(x):
    # Abramowitz & Stegun 7.1.26 rational erf approximation, |err| <= 1.5e-7.
    # Only mul/add/exp/reciprocal, so it lowers cleanly on the VPU + EUP.
    # The reciprocal runs on the (otherwise mostly idle) EUP; one Newton step
    # on the VPU restores f32-level accuracy.
    a1 = 0.254829592
    a2 = -0.284496736
    a3 = 1.421413741
    a4 = -1.453152027
    a5 = 1.061405429
    p = 0.3275911
    sgn = jnp.where(x >= 0.0, 1.0, -1.0).astype(x.dtype)
    ax = jnp.abs(x)
    d = 1.0 + p * ax
    t = pl.reciprocal(d, approx=True)
    t = t * (2.0 - d * t)              # one Newton-Raphson refinement
    poly = ((((a5 * t + a4) * t + a3) * t + a2) * t + a1) * t
    return sgn * (1.0 - poly * jnp.exp(-ax * ax))


def _gelu_exact(x):
    # torch.nn.GELU() default: 0.5 * x * (1 + erf(x / sqrt(2))).  Keep in f32.
    return 0.5 * x * (1.0 + _erf_approx(x * 0.7071067811865476))


def _fc_adapter_kernel(x_ref, w1_ref, b1_ref, w2_ref, b2_ref, o_ref):
    # x: (TM, D1); w1: (D1, D2); b1: (1, D2); w2: (D2, D3); b2: (1, D3)
    x = x_ref[...]
    h = jnp.dot(x, w1_ref[...], preferred_element_type=jnp.float32)
    h = _gelu_exact(h + b1_ref[...].astype(jnp.float32))
    y = jnp.dot(h.astype(w2_ref.dtype), w2_ref[...],
                preferred_element_type=jnp.float32)
    y = _gelu_exact(y + b2_ref[...].astype(jnp.float32))
    o_ref[...] = y.astype(o_ref.dtype)


def _pick_pack_factor(m, dim1, dim2, dim3, w_itemsize):
    """Rows fused along the feature axis so blocks become >=128 lanes wide."""
    if m <= 1 or min(dim1, dim3) >= _LANE:
        return 1
    r = 1
    for cand in (2, 4, 8):
        if m % cand != 0:
            break
        if r * min(dim1, dim3) >= _LANE:
            break                       # narrow side already lane-dense
        # Block-diagonal weights grow ~cand^2; keep them modest.
        if cand * cand * (dim1 * dim2 + dim2 * dim3) * w_itemsize > (16 << 20):
            break
        r = cand
    return r


def _pick_block_rows(mp, pd1, pd2, pd3, x_isz, w_isz, o_isz):
    """Packed rows per grid step, chosen from a VMEM budget."""
    # Weights counted twice in case single-buffering is not honored.
    weight_bytes = (pd1 * pd2 + pd2 + pd2 * pd3 + pd3) * w_isz
    budget = _VMEM_TILE_BUDGET - 2 * weight_bytes
    # Pipelined in/out blocks are double-buffered; f32 intermediates (h, y and
    # elementwise temps) accounted with a conservative factor of 4.
    per_row = (2 * pd1 * x_isz + 2 * pd3 * o_isz + 4 * (pd2 + pd3) * 4)
    tm = max(_SUBLANE, max(budget, 0) // per_row)
    tm = min(tm, _MAX_BLOCK_ROWS)
    # Keep >= 2 grid steps when there is enough work so ("parallel",) can use
    # both TensorCores on v7x.
    if mp > _SUBLANE:
        tm = min(tm, _round_up(pl.cdiv(mp, 2), _SUBLANE))
    if tm >= mp:
        return mp                       # single, full-array block
    return max(_SUBLANE, tm // _SUBLANE * _SUBLANE)


def fc_adapter_forward(x, w1, b1, w2, b2):
    """Pallas TPU equivalent of FC_adapter.forward(x).

    x:  (..., dim1)   (f32 or bf16)
    w1: (dim1, dim2)  (transpose of PyTorch's Linear.weight layout)
    b1: (dim2,)
    w2: (dim2, dim3)
    b2: (dim3,)
    returns (..., dim3) in x.dtype; matmul accumulation and GELU are f32.
    """
    *lead, dim1 = x.shape
    assert w1.shape[0] == dim1
    dim2 = w1.shape[1]
    assert w2.shape[0] == dim2
    dim3 = w2.shape[1]
    out_dtype = x.dtype

    m = math.prod(lead) if lead else 1
    if m == 0:
        return jnp.zeros((*lead, dim3), dtype=out_dtype)

    x_isz = jnp.dtype(x.dtype).itemsize
    w_isz = jnp.dtype(w1.dtype).itemsize
    o_isz = jnp.dtype(out_dtype).itemsize

    # --- lane-density packing (free, byte-identical row-major reshape) ---
    r = _pick_pack_factor(m, dim1, dim2, dim3, w_isz)
    mp = m // r
    pd1, pd2, pd3 = r * dim1, r * dim2, r * dim3

    x2 = x.reshape(mp, pd1)
    if r > 1:
        # Block-diagonal weights keep the per-row math identical while the
        # kernel sees >=128-lane slabs end to end (loads, GELUs, stores).
        w1p = jnp.kron(jnp.eye(r, dtype=w1.dtype), w1)
        w2p = jnp.kron(jnp.eye(r, dtype=w2.dtype), w2)
        b1p = jnp.tile(b1, r)
        b2p = jnp.tile(b2, r)
    else:
        w1p, w2p, b1p, b2p = w1, w2, b1, b2

    tm = _pick_block_rows(mp, pd1, pd2, pd3, x_isz, w_isz, o_isz)
    grid = (pl.cdiv(mp, tm),)

    flops = 2 * mp * (pd1 * pd2 + pd2 * pd3)
    transcendentals = 2 * mp * (pd2 + pd3)      # exp + reciprocal per GELU elem
    bytes_accessed = (mp * (pd1 * x_isz + pd3 * o_isz)
                      + (pd1 * pd2 + pd2 + pd2 * pd3 + pd3) * w_isz)

    def _call(single_buffer_weights):
        w_kwargs = ({"pipeline_mode": pl.Buffered(buffer_count=1)}
                    if single_buffer_weights else {})
        grid_spec = pltpu.PrefetchScalarGridSpec(
            num_scalar_prefetch=0,
            grid=grid,
            in_specs=[
                # Activations stream through; the ragged last block is safe
                # because rows are independent (no cross-row reduction).
                pl.BlockSpec((tm, pd1), lambda i: (i, 0)),
                # Weights/biases: constant index_map => DMA'd once, resident
                # across the grid; single-buffered to halve their VMEM use.
                pl.BlockSpec((pd1, pd2), lambda i: (0, 0), **w_kwargs),
                pl.BlockSpec((1, pd2), lambda i: (0, 0), **w_kwargs),
                pl.BlockSpec((pd2, pd3), lambda i: (0, 0), **w_kwargs),
                pl.BlockSpec((1, pd3), lambda i: (0, 0), **w_kwargs),
            ],
            out_specs=pl.BlockSpec((tm, pd3), lambda i: (i, 0)),
        )
        return pl.pallas_call(
            _fc_adapter_kernel,
            out_shape=jax.ShapeDtypeStruct((mp, pd3), out_dtype),
            grid_spec=grid_spec,
            compiler_params=pltpu.CompilerParams(
                dimension_semantics=("parallel",),   # megacore sharding (v7x)
                vmem_limit_bytes=_VMEM_LIMIT_BYTES,
            ),
            cost_estimate=pl.CostEstimate(
                flops=flops,
                transcendentals=transcendentals,
                bytes_accessed=bytes_accessed,
            ),
        )(x2, w1p, b1p.reshape(1, pd2), w2p, b2p.reshape(1, pd3))

    try:
        out_packed = _call(True)
    except Exception:
        # Fallback for jax versions where BlockSpec(pipeline_mode=Buffered(1))
        # is unsupported: weights just get double-buffered (same numerics,
        # extra VMEM only).
        out_packed = _call(False)

    out = out_packed.reshape(m, dim3)
    return out.reshape(*lead, dim3) if lead else out.reshape(dim3)


def _reference(x, w1, b1, w2, b2):
    # Pure-JAX replica of the PyTorch module (exact erf GELU).
    from jax.scipy.special import erf

    def gelu(v):
        return 0.5 * v * (1.0 + erf(v / jnp.sqrt(2.0).astype(v.dtype)))

    h = gelu(jnp.dot(x, w1, precision=jax.lax.Precision.HIGHEST) + b1)
    return gelu(jnp.dot(h, w2, precision=jax.lax.Precision.HIGHEST) + b2)


if __name__ == "__main__":
    # Small shapes consistent with the module: batch=2, seq=8, dims 32->64->32.
    dim1, dim2, dim3 = 32, 64, 32
    batch, seq = 2, 8

    key = jax.random.PRNGKey(0)
    kx, k1, k2, k3, k4 = jax.random.split(key, 5)

    x = jax.random.normal(kx, (batch, seq, dim1), dtype=jnp.float32)

    # PyTorch Linear default init: U(-1/sqrt(fan_in), 1/sqrt(fan_in)).
    lim1 = 1.0 / math.sqrt(dim1)
    w1 = jax.random.uniform(k1, (dim1, dim2), jnp.float32, -lim1, lim1)
    b1 = jax.random.uniform(k2, (dim2,), jnp.float32, -lim1, lim1)
    lim2 = 1.0 / math.sqrt(dim2)
    w2 = jax.random.uniform(k3, (dim2, dim3), jnp.float32, -lim2, lim2)
    b2 = jax.random.uniform(k4, (dim3,), jnp.float32, -lim2, lim2)

    out = fc_adapter_forward(x, w1, b1, w2, b2)
    out = jax.block_until_ready(out)

    ref = _reference(x, w1, b1, w2, b2)
    assert out.shape == (batch, seq, dim3), out.shape
    assert out.dtype == jnp.float32
    max_err = float(jnp.max(jnp.abs(out - ref)))
    # Tolerance covers the A&S erf approximation (~1.5e-7) plus the EUP
    # approximate-reciprocal + Newton-step path.
    assert jnp.allclose(out, ref, atol=2e-4, rtol=2e-4), max_err

    print("KERNEL_OK")
</pallas_src>

<mosaic_0001>
module attributes {stable_mosaic.version = 11 : i64} {
  func.func @_fc_adapter_kernel(%arg0: i32, %arg1: memref<4x128xf32, #tpu.memory_space<vmem>>, %arg2: memref<128x256xf32, #tpu.memory_space<vmem>>, %arg3: memref<1x256xf32, #tpu.memory_space<vmem>>, %arg4: memref<256x128xf32, #tpu.memory_space<vmem>>, %arg5: memref<1x128xf32, #tpu.memory_space<vmem>>, %arg6: memref<4x128xf32, #tpu.memory_space<vmem>>) attributes {dimension_semantics = [#tpu.dimension_semantics<parallel>], iteration_bounds = array<i64: 1>, scalar_prefetch = 0 : i64, scratch_operands = 0 : i64, tpu.core_type = #tpu.core_type<tc>, window_params = [{transform_indices = @transform_0, window_bounds = array<i64: 4, 128>}, {pipeline_mode = #tpu.pipeline_mode<synchronous>, transform_indices = @transform_1, window_bounds = array<i64: 128, 256>}, {pipeline_mode = #tpu.pipeline_mode<synchronous>, transform_indices = @transform_2, window_bounds = array<i64: 1, 256>}, {pipeline_mode = #tpu.pipeline_mode<synchronous>, transform_indices = @transform_3, window_bounds = array<i64: 256, 128>}, {pipeline_mode = #tpu.pipeline_mode<synchronous>, transform_indices = @transform_4, window_bounds = array<i64: 1, 128>}, {transform_indices = @transform_5, window_bounds = array<i64: 4, 128>}]} {
    %c0 = arith.constant 0 : index
    %c0_0 = arith.constant 0 : index
    %0 = vector.load %arg1[%c0, %c0_0] : memref<4x128xf32, #tpu.memory_space<vmem>>, vector<4x128xf32>
    %c0_1 = arith.constant 0 : index
    %c0_2 = arith.constant 0 : index
    %1 = vector.load %arg2[%c0_1, %c0_2] : memref<128x256xf32, #tpu.memory_space<vmem>>, vector<128x256xf32>
    %cst = arith.constant dense<0.000000e+00> : vector<4x256xf32>
    %2 = tpu.matmul %0, %1, %cst {dimension_numbers = #tpu.dot_dimension_numbers<[1], [0], [0], [1], [0, 0, 1, 1], [], []>} : vector<4x128xf32>, vector<128x256xf32>, vector<4x256xf32> -> vector<4x256xf32>
    %c0_3 = arith.constant 0 : index
    %c0_4 = arith.constant 0 : index
    %3 = vector.load %arg3[%c0_3, %c0_4] : memref<1x256xf32, #tpu.memory_space<vmem>>, vector<1x256xf32>
    %4 = vector.broadcast %3 : vector<1x256xf32> to vector<4x256xf32>
    %5 = arith.addf %2, %4 : vector<4x256xf32>
    %cst_5 = arith.constant 5.000000e-01 : f32
    %6 = vector.broadcast %cst_5 : f32 to vector<4x256xf32>
    %7 = arith.mulf %6, %5 : vector<4x256xf32>
    %cst_6 = arith.constant 0.707106769 : f32
    %8 = vector.broadcast %cst_6 : f32 to vector<4x256xf32>
    %9 = arith.mulf %5, %8 : vector<4x256xf32>
    %cst_7 = arith.constant 0.000000e+00 : f32
    %10 = vector.broadcast %cst_7 : f32 to vector<4x256xf32>
    %11 = arith.cmpf oge, %9, %10 : vector<4x256xf32>
    %cst_8 = arith.constant 1.000000e+00 : f32
    %cst_9 = arith.constant -1.000000e+00 : f32
    %12 = vector.broadcast %cst_8 : f32 to vector<4x256xf32>
    %13 = vector.broadcast %cst_9 : f32 to vector<4x256xf32>
    %14 = arith.select %11, %12, %13 : vector<4x256xi1>, vector<4x256xf32>
    %15 = math.absf %9 : vector<4x256xf32>
    %cst_10 = arith.constant 0.327591091 : f32
    %16 = vector.broadcast %cst_10 : f32 to vector<4x256xf32>
    %17 = arith.mulf %16, %15 : vector<4x256xf32>
    %cst_11 = arith.constant 1.000000e+00 : f32
    %18 = vector.broadcast %cst_11 : f32 to vector<4x256xf32>
    %19 = arith.addf %18, %17 : vector<4x256xf32>
    %20 = tpu.reciprocal %19 {approx = true} : vector<4x256xf32> -> vector<4x256xf32>
    %21 = arith.mulf %19, %20 : vector<4x256xf32>
    %cst_12 = arith.constant 2.000000e+00 : f32
    %22 = vector.broadcast %cst_12 : f32 to vector<4x256xf32>
    %23 = arith.subf %22, %21 : vector<4x256xf32>
    %24 = arith.mulf %20, %23 : vector<4x256xf32>
    %cst_13 = arith.constant 1.06140542 : f32
    %25 = vector.broadcast %cst_13 : f32 to vector<4x256xf32>
    %26 = arith.mulf %25, %24 : vector<4x256xf32>
    %cst_14 = arith.constant -1.45315206 : f32
    %27 = vector.broadcast %cst_14 : f32 to vector<4x256xf32>
    %28 = arith.addf %26, %27 : vector<4x256xf32>
    %29 = arith.mulf %28, %24 : vector<4x256xf32>
    %cst_15 = arith.constant 1.42141378 : f32
    %30 = vector.broadcast %cst_15 : f32 to vector<4x256xf32>
    %31 = arith.addf %29, %30 : vector<4x256xf32>
    %32 = arith.mulf %31, %24 : vector<4x256xf32>
    %cst_16 = arith.constant -0.284496725 : f32
    %33 = vector.broadcast %cst_16 : f32 to vector<4x256xf32>
    %34 = arith.addf %32, %33 : vector<4x256xf32>
    %35 = arith.mulf %34, %24 : vector<4x256xf32>
    %cst_17 = arith.constant 0.254829586 : f32
    %36 = vector.broadcast %cst_17 : f32 to vector<4x256xf32>
    %37 = arith.addf %35, %36 : vector<4x256xf32>
    %38 = arith.mulf %37, %24 : vector<4x256xf32>
    %cst_18 = arith.constant 0.000000e+00 : f32
    %39 = vector.broadcast %cst_18 : f32 to vector<4x256xf32>
    %40 = arith.subf %39, %15 : vector<4x256xf32>
    %41 = arith.mulf %40, %15 : vector<4x256xf32>
    %42 = math.exp %41 : vector<4x256xf32>
    %43 = arith.mulf %38, %42 : vector<4x256xf32>
    %cst_19 = arith.constant 1.000000e+00 : f32
    %44 = vector.broadcast %cst_19 : f32 to vector<4x256xf32>
    %45 = arith.subf %44, %43 : vector<4x256xf32>
    %46 = arith.mulf %14, %45 : vector<4x256xf32>
    %cst_20 = arith.constant 1.000000e+00 : f32
    %47 = vector.broadcast %cst_20 : f32 to vector<4x256xf32>
    %48 = arith.addf %47, %46 : vector<4x256xf32>
    %49 = arith.mulf %7, %48 : vector<4x256xf32>
    %c0_21 = arith.constant 0 : index
    %c0_22 = arith.constant 0 : index
    %50 = vector.load %arg4[%c0_21, %c0_22] : memref<256x128xf32, #tpu.memory_space<vmem>>, vector<256x128xf32>
    %cst_23 = arith.constant dense<0.000000e+00> : vector<4x128xf32>
    %51 = tpu.matmul %49, %50, %cst_23 {dimension_numbers = #tpu.dot_dimension_numbers<[1], [0], [0], [1], [0, 0, 1, 1], [], []>} : vector<4x256xf32>, vector<256x128xf32>, vector<4x128xf32> -> vector<4x128xf32>
    %c0_24 = arith.constant 0 : index
    %c0_25 = arith.constant 0 : index
    %52 = vector.load %arg5[%c0_24, %c0_25] : memref<1x128xf32, #tpu.memory_space<vmem>>, vector<1x128xf32>
    %53 = vector.broadcast %52 : vector<1x128xf32> to vector<4x128xf32>
    %54 = arith.addf %51, %53 : vector<4x128xf32>
    %cst_26 = arith.constant 5.000000e-01 : f32
    %55 = vector.broadcast %cst_26 : f32 to vector<4x128xf32>
    %56 = arith.mulf %55, %54 : vector<4x128xf32>
    %cst_27 = arith.constant 0.707106769 : f32
    %57 = vector.broadcast %cst_27 : f32 to vector<4x128xf32>
    %58 = arith.mulf %54, %57 : vector<4x128xf32>
    %cst_28 = arith.constant 0.000000e+00 : f32
    %59 = vector.broadcast %cst_28 : f32 to vector<4x128xf32>
    %60 = arith.cmpf oge, %58, %59 : vector<4x128xf32>
    %cst_29 = arith.constant 1.000000e+00 : f32
    %cst_30 = arith.constant -1.000000e+00 : f32
    %61 = vector.broadcast %cst_29 : f32 to vector<4x128xf32>
    %62 = vector.broadcast %cst_30 : f32 to vector<4x128xf32>
    %63 = arith.select %60, %61, %62 : vector<4x128xi1>, vector<4x128xf32>
    %64 = math.absf %58 : vector<4x128xf32>
    %cst_31 = arith.constant 0.327591091 : f32
    %65 = vector.broadcast %cst_31 : f32 to vector<4x128xf32>
    %66 = arith.mulf %65, %64 : vector<4x128xf32>
    %cst_32 = arith.constant 1.000000e+00 : f32
    %67 = vector.broadcast %cst_32 : f32 to vector<4x128xf32>
    %68 = arith.addf %67, %66 : vector<4x128xf32>
    %69 = tpu.reciprocal %68 {approx = true} : vector<4x128xf32> -> vector<4x128xf32>
    %70 = arith.mulf %68, %69 : vector<4x128xf32>
    %cst_33 = arith.constant 2.000000e+00 : f32
    %71 = vector.broadcast %cst_33 : f32 to vector<4x128xf32>
    %72 = arith.subf %71, %70 : vector<4x128xf32>
    %73 = arith.mulf %69, %72 : vector<4x128xf32>
    %cst_34 = arith.constant 1.06140542 : f32
    %74 = vector.broadcast %cst_34 : f32 to vector<4x128xf32>
    %75 = arith.mulf %74, %73 : vector<4x128xf32>
    %cst_35 = arith.constant -1.45315206 : f32
    %76 = vector.broadcast %cst_35 : f32 to vector<4x128xf32>
    %77 = arith.addf %75, %76 : vector<4x128xf32>
    %78 = arith.mulf %77, %73 : vector<4x128xf32>
    %cst_36 = arith.constant 1.42141378 : f32
    %79 = vector.broadcast %cst_36 : f32 to vector<4x128xf32>
    %80 = arith.addf %78, %79 : vector<4x128xf32>
    %81 = arith.mulf %80, %73 : vector<4x128xf32>
    %cst_37 = arith.constant -0.284496725 : f32
    %82 = vector.broadcast %cst_37 : f32 to vector<4x128xf32>
    %83 = arith.addf %81, %82 : vector<4x128xf32>
    %84 = arith.mulf %83, %73 : vector<4x128xf32>
    %cst_38 = arith.constant 0.254829586 : f32
    %85 = vector.broadcast %cst_38 : f32 to vector<4x128xf32>
    %86 = arith.addf %84, %85 : vector<4x128xf32>
    %87 = arith.mulf %86, %73 : vector<4x128xf32>
    %cst_39 = arith.constant 0.000000e+00 : f32
    %88 = vector.broadcast %cst_39 : f32 to vector<4x128xf32>
    %89 = arith.subf %88, %64 : vector<4x128xf32>
    %90 = arith.mulf %89, %64 : vector<4x128xf32>
    %91 = math.exp %90 : vector<4x128xf32>
    %92 = arith.mulf %87, %91 : vector<4x128xf32>
    %cst_40 = arith.constant 1.000000e+00 : f32
    %93 = vector.broadcast %cst_40 : f32 to vector<4x128xf32>
    %94 = arith.subf %93, %92 : vector<4x128xf32>
    %95 = arith.mulf %63, %94 : vector<4x128xf32>
    %cst_41 = arith.constant 1.000000e+00 : f32
    %96 = vector.broadcast %cst_41 : f32 to vector<4x128xf32>
    %97 = arith.addf %96, %95 : vector<4x128xf32>
    %98 = arith.mulf %56, %97 : vector<4x128xf32>
    %c0_42 = arith.constant 0 : index
    %c0_43 = arith.constant 0 : index
    %99 = vector.load %arg6[%c0_42, %c0_43] : memref<4x128xf32, #tpu.memory_space<vmem>>, vector<4x128xf32>
    tpu.vector_store %arg6[%c0_42, %c0_43], %98 {strides = array<i32>} : memref<4x128xf32, #tpu.memory_space<vmem>>, vector<4x128xf32>,
    return
  }
  func.func @transform_0(%arg0: i32) -> (i32, i32) {
    %c0_i32 = arith.constant 0 : i32
    %c0_i32_0 = arith.constant 0 : i32
    return %arg0, %c0_i32 : i32, i32
  }
  func.func @transform_1(%arg0: i32) -> (i32, i32) {
    %c0_i32 = arith.constant 0 : i32
    %c0_i32_0 = arith.constant 0 : i32
    %c0_i32_1 = arith.constant 0 : i32
    return %c0_i32, %c0_i32_0 : i32, i32
  }
  func.func @transform_2(%arg0: i32) -> (i32, i32) {
    %c0_i32 = arith.constant 0 : i32
    %c0_i32_0 = arith.constant 0 : i32
    %c0_i32_1 = arith.constant 0 : i32
    return %c0_i32, %c0_i32_0 : i32, i32
  }
  func.func @transform_3(%arg0: i32) -> (i32, i32) {
    %c0_i32 = arith.constant 0 : i32
    %c0_i32_0 = arith.constant 0 : i32
    %c0_i32_1 = arith.constant 0 : i32
    return %c0_i32, %c0_i32_0 : i32, i32
  }
  func.func @transform_4(%arg0: i32) -> (i32, i32) {
    %c0_i32 = arith.constant 0 : i32
    %c0_i32_0 = arith.constant 0 : i32
    %c0_i32_1 = arith.constant 0 : i32
    return %c0_i32, %c0_i32_0 : i32, i32
  }
  func.func @transform_5(%arg0: i32) -> (i32, i32) {
    %c0_i32 = arith.constant 0 : i32
    %c0_i32_0 = arith.constant 0 : i32
    return %arg0, %c0_i32 : i32, i32
  }
}

module attributes {stable_mosaic.version = 11 : i64} {
  func.func @_fc_adapter_kernel(%arg0: i32, %arg1: memref<4x128xf32, #tpu.memory_space<vmem>>, %arg2: memref<128x256xf32, #tpu.memory_space<vmem>>, %arg3: memref<1x256xf32, #tpu.memory_space<vmem>>, %arg4: memref<256x128xf32, #tpu.memory_space<vmem>>, %arg5: memref<1x128xf32, #tpu.memory_space<vmem>>, %arg6: memref<4x128xf32, #tpu.memory_space<vmem>>) attributes {dimension_semantics = [#tpu.dimension_semantics<parallel>], iteration_bounds = array<i64: 1>, scalar_prefetch = 0 : i64, scratch_operands = 0 : i64, tpu.core_type = #tpu.core_type<tc>, window_params = [{transform_indices = @transform_0, window_bounds = array<i64: 4, 128>}, {pipeline_mode = #tpu.pipeline_mode<synchronous>, transform_indices = @transform_1, window_bounds = array<i64: 128, 256>}, {pipeline_mode = #tpu.pipeline_mode<synchronous>, transform_indices = @transform_2, window_bounds = array<i64: 1, 256>}, {pipeline_mode = #tpu.pipeline_mode<synchronous>, transform_indices = @transform_3, window_bounds = array<i64: 256, 128>}, {pipeline_mode = #tpu.pipeline_mode<synchronous>, transform_indices = @transform_4, window_bounds = array<i64: 1, 128>}, {transform_indices = @transform_5, window_bounds = array<i64: 4, 128>}]} {
    %c0 = arith.constant 0 : index
    %c0_0 = arith.constant 0 : index
    %0 = vector.load %arg1[%c0, %c0_0] : memref<4x128xf32, #tpu.memory_space<vmem>>, vector<4x128xf32>
    %c0_1 = arith.constant 0 : index
    %c0_2 = arith.constant 0 : index
    %1 = vector.load %arg2[%c0_1, %c0_2] : memref<128x256xf32, #tpu.memory_space<vmem>>, vector<128x256xf32>
    %cst = arith.constant dense<0.000000e+00> : vector<4x256xf32>
    %2 = tpu.matmul %0, %1, %cst {dimension_numbers = #tpu.dot_dimension_numbers<[1], [0], [0], [1], [0, 0, 1, 1], [], []>} : vector<4x128xf32>, vector<128x256xf32>, vector<4x256xf32> -> vector<4x256xf32>
    %c0_3 = arith.constant 0 : index
    %c0_4 = arith.constant 0 : index
    %3 = vector.load %arg3[%c0_3, %c0_4] : memref<1x256xf32, #tpu.memory_space<vmem>>, vector<1x256xf32>
    %4 = vector.broadcast %3 : vector<1x256xf32> to vector<4x256xf32>
    %5 = arith.addf %2, %4 : vector<4x256xf32>
    %cst_5 = arith.constant 5.000000e-01 : f32
    %6 = vector.broadcast %cst_5 : f32 to vector<4x256xf32>
    %7 = arith.mulf %6, %5 : vector<4x256xf32>
    %cst_6 = arith.constant 0.707106769 : f32
    %8 = vector.broadcast %cst_6 : f32 to vector<4x256xf32>
    %9 = arith.mulf %5, %8 : vector<4x256xf32>
    %cst_7 = arith.constant 0.000000e+00 : f32
    %10 = vector.broadcast %cst_7 : f32 to vector<4x256xf32>
    %11 = arith.cmpf oge, %9, %10 : vector<4x256xf32>
    %cst_8 = arith.constant 1.000000e+00 : f32
    %cst_9 = arith.constant -1.000000e+00 : f32
    %12 = vector.broadcast %cst_8 : f32 to vector<4x256xf32>
    %13 = vector.broadcast %cst_9 : f32 to vector<4x256xf32>
    %14 = arith.select %11, %12, %13 : vector<4x256xi1>, vector<4x256xf32>
    %15 = math.absf %9 : vector<4x256xf32>
    %cst_10 = arith.constant 0.327591091 : f32
    %16 = vector.broadcast %cst_10 : f32 to vector<4x256xf32>
    %17 = arith.mulf %16, %15 : vector<4x256xf32>
    %cst_11 = arith.constant 1.000000e+00 : f32
    %18 = vector.broadcast %cst_11 : f32 to vector<4x256xf32>
    %19 = arith.addf %18, %17 : vector<4x256xf32>
    %20 = tpu.reciprocal %19 {approx = true} : vector<4x256xf32> -> vector<4x256xf32>
    %21 = arith.mulf %19, %20 : vector<4x256xf32>
    %cst_12 = arith.constant 2.000000e+00 : f32
    %22 = vector.broadcast %cst_12 : f32 to vector<4x256xf32>
    %23 = arith.subf %22, %21 : vector<4x256xf32>
    %24 = arith.mulf %20, %23 : vector<4x256xf32>
    %cst_13 = arith.constant 1.06140542 : f32
    %25 = vector.broadcast %cst_13 : f32 to vector<4x256xf32>
    %26 = arith.mulf %25, %24 : vector<4x256xf32>
    %cst_14 = arith.constant -1.45315206 : f32
    %27 = vector.broadcast %cst_14 : f32 to vector<4x256xf32>
    %28 = arith.addf %26, %27 : vector<4x256xf32>
    %29 = arith.mulf %28, %24 : vector<4x256xf32>
    %cst_15 = arith.constant 1.42141378 : f32
    %30 = vector.broadcast %cst_15 : f32 to vector<4x256xf32>
    %31 = arith.addf %29, %30 : vector<4x256xf32>
    %32 = arith.mulf %31, %24 : vector<4x256xf32>
    %cst_16 = arith.constant -0.284496725 : f32
    %33 = vector.broadcast %cst_16 : f32 to vector<4x256xf32>
    %34 = arith.addf %32, %33 : vector<4x256xf32>
    %35 = arith.mulf %34, %24 : vector<4x256xf32>
    %cst_17 = arith.constant 0.254829586 : f32
    %36 = vector.broadcast %cst_17 : f32 to vector<4x256xf32>
    %37 = arith.addf %35, %36 : vector<4x256xf32>
    %38 = arith.mulf %37, %24 : vector<4x256xf32>
    %cst_18 = arith.constant 0.000000e+00 : f32
    %39 = vector.broadcast %cst_18 : f32 to vector<4x256xf32>
    %40 = arith.subf %39, %15 : vector<4x256xf32>
    %41 = arith.mulf %40, %15 : vector<4x256xf32>
    %42 = math.exp %41 : vector<4x256xf32>
    %43 = arith.mulf %38, %42 : vector<4x256xf32>
    %cst_19 = arith.constant 1.000000e+00 : f32
    %44 = vector.broadcast %cst_19 : f32 to vector<4x256xf32>
    %45 = arith.subf %44, %43 : vector<4x256xf32>
    %46 = arith.mulf %14, %45 : vector<4x256xf32>
    %cst_20 = arith.constant 1.000000e+00 : f32
    %47 = vector.broadcast %cst_20 : f32 to vector<4x256xf32>
    %48 = arith.addf %47, %46 : vector<4x256xf32>
    %49 = arith.mulf %7, %48 : vector<4x256xf32>
    %c0_21 = arith.constant 0 : index
    %c0_22 = arith.constant 0 : index
    %50 = vector.load %arg4[%c0_21, %c0_22] : memref<256x128xf32, #tpu.memory_space<vmem>>, vector<256x128xf32>
    %cst_23 = arith.constant dense<0.000000e+00> : vector<4x128xf32>
    %51 = tpu.matmul %49, %50, %cst_23 {dimension_numbers = #tpu.dot_dimension_numbers<[1], [0], [0], [1], [0, 0, 1, 1], [], []>} : vector<4x256xf32>, vector<256x128xf32>, vector<4x128xf32> -> vector<4x128xf32>
    %c0_24 = arith.constant 0 : index
    %c0_25 = arith.constant 0 : index
    %52 = vector.load %arg5[%c0_24, %c0_25] : memref<1x128xf32, #tpu.memory_space<vmem>>, vector<1x128xf32>
    %53 = vector.broadcast %52 : vector<1x128xf32> to vector<4x128xf32>
    %54 = arith.addf %51, %53 : vector<4x128xf32>
    %cst_26 = arith.constant 5.000000e-01 : f32
    %55 = vector.broadcast %cst_26 : f32 to vector<4x128xf32>
    %56 = arith.mulf %55, %54 : vector<4x128xf32>
    %cst_27 = arith.constant 0.707106769 : f32
    %57 = vector.broadcast %cst_27 : f32 to vector<4x128xf32>
    %58 = arith.mulf %54, %57 : vector<4x128xf32>
    %cst_28 = arith.constant 0.000000e+00 : f32
    %59 = vector.broadcast %cst_28 : f32 to vector<4x128xf32>
    %60 = arith.cmpf oge, %58, %59 : vector<4x128xf32>
    %cst_29 = arith.constant 1.000000e+00 : f32
    %cst_30 = arith.constant -1.000000e+00 : f32
    %61 = vector.broadcast %cst_29 : f32 to vector<4x128xf32>
    %62 = vector.broadcast %cst_30 : f32 to vector<4x128xf32>
    %63 = arith.select %60, %61, %62 : vector<4x128xi1>, vector<4x128xf32>
    %64 = math.absf %58 : vector<4x128xf32>
    %cst_31 = arith.constant 0.327591091 : f32
    %65 = vector.broadcast %cst_31 : f32 to vector<4x128xf32>
    %66 = arith.mulf %65, %64 : vector<4x128xf32>
    %cst_32 = arith.constant 1.000000e+00 : f32
    %67 = vector.broadcast %cst_32 : f32 to vector<4x128xf32>
    %68 = arith.addf %67, %66 : vector<4x128xf32>
    %69 = tpu.reciprocal %68 {approx = true} : vector<4x128xf32> -> vector<4x128xf32>
    %70 = arith.mulf %68, %69 : vector<4x128xf32>
    %cst_33 = arith.constant 2.000000e+00 : f32
    %71 = vector.broadcast %cst_33 : f32 to vector<4x128xf32>
    %72 = arith.subf %71, %70 : vector<4x128xf32>
    %73 = arith.mulf %69, %72 : vector<4x128xf32>
    %cst_34 = arith.constant 1.06140542 : f32
    %74 = vector.broadcast %cst_34 : f32 to vector<4x128xf32>
    %75 = arith.mulf %74, %73 : vector<4x128xf32>
    %cst_35 = arith.constant -1.45315206 : f32
    %76 = vector.broadcast %cst_35 : f32 to vector<4x128xf32>
    %77 = arith.addf %75, %76 : vector<4x128xf32>
    %78 = arith.mulf %77, %73 : vector<4x128xf32>
    %cst_36 = arith.constant 1.42141378 : f32
    %79 = vector.broadcast %cst_36 : f32 to vector<4x128xf32>
    %80 = arith.addf %78, %79 : vector<4x128xf32>
    %81 = arith.mulf %80, %73 : vector<4x128xf32>
    %cst_37 = arith.constant -0.284496725 : f32
    %82 = vector.broadcast %cst_37 : f32 to vector<4x128xf32>
    %83 = arith.addf %81, %82 : vector<4x128xf32>
    %84 = arith.mulf %83, %73 : vector<4x128xf32>
    %cst_38 = arith.constant 0.254829586 : f32
    %85 = vector.broadcast %cst_38 : f32 to vector<4x128xf32>
    %86 = arith.addf %84, %85 : vector<4x128xf32>
    %87 = arith.mulf %86, %73 : vector<4x128xf32>
    %cst_39 = arith.constant 0.000000e+00 : f32
    %88 = vector.broadcast %cst_39 : f32 to vector<4x128xf32>
    %89 = arith.subf %88, %64 : vector<4x128xf32>
    %90 = arith.mulf %89, %64 : vector<4x128xf32>
    %91 = math.exp %90 : vector<4x128xf32>
    %92 = arith.mulf %87, %91 : vector<4x128xf32>
    %cst_40 = arith.constant 1.000000e+00 : f32
    %93 = vector.broadcast %cst_40 : f32 to vector<4x128xf32>
    %94 = arith.subf %93, %92 : vector<4x128xf32>
    %95 = arith.mulf %63, %94 : vector<4x128xf32>
    %cst_41 = arith.constant 1.000000e+00 : f32
    %96 = vector.broadcast %cst_41 : f32 to vector<4x128xf32>
    %97 = arith.addf %96, %95 : vector<4x128xf32>
    %98 = arith.mulf %56, %97 : vector<4x128xf32>
    %c0_42 = arith.constant 0 : index
    %c0_43 = arith.constant 0 : index
    %99 = vector.load %arg6[%c0_42, %c0_43] : memref<4x128xf32, #tpu.memory_space<vmem>>, vector<4x128xf32>
    tpu.vector_store %arg6[%c0_42, %c0_43], %98 {strides = array<i32>} : memref<4x128xf32, #tpu.memory_space<vmem>>, vector<4x128xf32>,
    return
  }
  func.func @transform_0(%arg0: i32) -> (i32, i32) {
    %c0_i32 = arith.constant 0 : i32
    %c0_i32_0 = arith.constant 0 : i32
    return %arg0, %c0_i32 : i32, i32
  }
  func.func @transform_1(%arg0: i32) -> (i32, i32) {
    %c0_i32 = arith.constant 0 : i32
    %c0_i32_0 = arith.constant 0 : i32
    %c0_i32_1 = arith.constant 0 : i32
    return %c0_i32, %c0_i32_0 : i32, i32
  }
  func.func @transform_2(%arg0: i32) -> (i32, i32) {
    %c0_i32 = arith.constant 0 : i32
    %c0_i32_0 = arith.constant 0 : i32
    %c0_i32_1 = arith.constant 0 : i32
    return %c0_i32, %c0_i32_0 : i32, i32
  }
  func.func @transform_3(%arg0: i32) -> (i32, i32) {
    %c0_i32 = arith.constant 0 : i32
    %c0_i32_0 = arith.constant 0 : i32
    %c0_i32_1 = arith.constant 0 : i32
    return %c0_i32, %c0_i32_0 : i32, i32
  }
  func.func @transform_4(%arg0: i32) -> (i32, i32) {
    %c0_i32 = arith.constant 0 : i32
    %c0_i32_0 = arith.constant 0 : i32
    %c0_i32_1 = arith.constant 0 : i32
    return %c0_i32, %c0_i32_0 : i32, i32
  }
  func.func @transform_5(%arg0: i32) -> (i32, i32) {
    %c0_i32 = arith.constant 0 : i32
    %c0_i32_0 = arith.constant 0 : i32
    return %arg0, %c0_i32 : i32, i32
  }
}

</mosaic_0001>

<bundles_post_ra>
// kernel: tpu_custom_call.1
= control target key start
LH: loop header
LB: loop body
LE: loop exit
PB: predicated region body
PF: predicated region fallthrough
CT: control target
= control target key end

     0   :  { %10 = vsyncpa [#allocation3], 0  ;;  %s567_s0 = inlined_call_operand.hbm [shape: f32[4,128], index: 0, kind: input, shape index: {}]   ;;  %s568_s1 = inlined_call_operand.hbm [shape: f32[128,256], index: 1, kind: input, shape index: {}]   ;;  %s569_s2 = inlined_call_operand.hbm [shape: f32[1,256], index: 2, kind: input, shape index: {}]   ;;  %s570_s3 = inlined_call_operand.hbm [shape: f32[256,128], index: 3, kind: input, shape index: {}]   ;;  %s571_s4 = inlined_call_operand.vmem [shape: f32[1,128], index: 4, kind: input, shape index: {}]   ;;  %s572_s5 = inlined_call_operand.hbm [shape: f32[4,128], index: 5, kind: output, shape index: {}]  }
   0x1   :  { %11 = vsyncpa [#allocation6], 0 }
   0x2   :  { %12 = vsyncpa [#allocation9], 0  ;;  %s29_s20 = sshll.u32 %s568_s1, 4  ;;  %s30_s20 = int_to_ptr.hbm [resolvable:$true] %s29_s20 }
   0x3   :  { %13 = vsyncpa [#allocation4], 0  ;;  %s493_s21 = smov [#allocation5]   ;;  %s19_s25 = sshll.u32 %s567_s0, 4  ;;  %s20_s25 = int_to_ptr.hbm [resolvable:$true] %s19_s25 }
   0x4   :  { %s31_s22 = sshll.u32 %s493_s21, 4  ;;  %s494_s26 = smov 256   ;;  %s32_s22 = int_to_ptr.vmem [resolvable:$true] %s31_s22 }
   0x5   :  { %s495_s27 = smov 16   ;;  %s496_s28 = smov [#allocation2]  }
   0x6   :  { %37 = dma.hbm_to_vmem [thread:$0]  %s30_s20, 4096, %s32_s22, [#allocation6], %s494_s26, %s494_s26, %s495_s27  }
   0x7   :  { %s21_s29 = sshll.u32 %s496_s28, 4  ;;  %s43_s7 = sshll.u32 %s569_s2, 4  ;;  %s22_s29 = int_to_ptr.vmem [resolvable:$true] %s21_s29  ;;  %s44_s7 = int_to_ptr.hbm [resolvable:$true] %s43_s7 }
   0x8   :  { %24 = dma.hbm_to_vmem [thread:$0]  %s20_s25, 64, %s22_s29, [#allocation3]  }
   0x9   :  { %s53_s9 = sshll.u32 %s570_s3, 4  ;;  %s497_s10 = smov [#allocation7]   ;;  %s54_s9 = int_to_ptr.hbm [resolvable:$true] %s53_s9 }
   0xa   :  { %s45_s11 = sshll.u32 %s497_s10, 4  ;;  %s498_s0 = smov [#allocation8]   ;;  %s46_s11 = int_to_ptr.vmem [resolvable:$true] %s45_s11 }
   0xb   :  { %48 = dma.hbm_to_vmem [thread:$0]  %s44_s7, 32, %s46_s11, [#allocation6]  }
   0xc   :  { %s55_s12 = sshll.u32 %s498_s0, 4  ;;  %s499_s13 = smov 128   ;;  %s56_s12 = int_to_ptr.vmem [resolvable:$true] %s55_s12 }
   0xd   :  { %s500_s14 = smov 8  }
   0xe   :  { %61 = dma.hbm_to_vmem [thread:$0]  %s54_s9, 4096, %s56_s12, [#allocation9], %s499_s13, %s499_s13, %s500_s14  }
   0xf   :  { %485 = dma.done.wait [#allocation3], 64  }
  0x10   :  { %486 = vsyncadd [#allocation3], 4294967232 }
  0x11   :  { %487 = dma.done.wait [#allocation6], 4128  }
  0x12   :  { %488 = vsyncadd [#allocation6], 4294963168 }
  0x13   :  { %489 = dma.done.wait [#allocation9], 4096  }
  0x14   :  { %490 = vsyncadd [#allocation9], 4294963200  ;;  %v111_v0 = vld [vmem:[#allocation5 + $0xf0] sm:$0xff]  ;;  %v112_v1 = vld [vmem:[#allocation5 + $0xf8] sm:$0xff]  ;;  %s330_s18 = sshll.u32 %s572_s5, 4  ;;  %s331_s18 = int_to_ptr.hbm [resolvable:$true] %s330_s18 }
  0x15   :  { %v109_v2 = vld [vmem:[#allocation5 + $0xe0] sm:$0xff]  ;;  %119 = vmatpush.msra.mxu0 %v111_v0  ;;  %139 = vmatpush.msra.mxu1 %v112_v1  ;;  %v110_v3 = vld [vmem:[#allocation5 + $0xe8] sm:$0xff]  ;;  %v107_v4 = vld [vmem:[#allocation5 + $0xd0] sm:$0xff] }
  0x16   :  { %v108_v5 = vld [vmem:[#allocation5 + $0xd8] sm:$0xff]  ;;  %v105_v6 = vld [vmem:[#allocation5 + $0xc0] sm:$0xff]  ;;  %v106_v7 = vld [vmem:[#allocation5 + $0xc8] sm:$0xff] }
  0x17   :  { %120 = vmatpush.msra.mxu0 %v109_v2  ;;  %140 = vmatpush.msra.mxu1 %v110_v3  ;;  %v103_v8 = vld [vmem:[#allocation5 + $0xb0] sm:$0xff]  ;;  %v104_v9 = vld [vmem:[#allocation5 + $0xb8] sm:$0xff]  ;;  %v101_v10 = vld [vmem:[#allocation5 + $0xa0] sm:$0xff] }
  0x18   :  { %v102_v11 = vld [vmem:[#allocation5 + $0xa8] sm:$0xff]  ;;  %v99_v12 = vld [vmem:[#allocation5 + $0x90] sm:$0xff]  ;;  %v100_v13 = vld [vmem:[#allocation5 + $0x98] sm:$0xff] }
  0x19   :  { %121 = vmatpush.msra.mxu0 %v107_v4  ;;  %141 = vmatpush.msra.mxu1 %v108_v5  ;;  %v97_v14 = vld [vmem:[#allocation5 + $0x80] sm:$0xff]  ;;  %v98_v15 = vld [vmem:[#allocation5 + $0x88] sm:$0xff]  ;;  %v95_v16 = vld [vmem:[#allocation5 + $0x70] sm:$0xff] }
  0x1a   :  { %v96_v17 = vld [vmem:[#allocation5 + $0x78] sm:$0xff]  ;;  %v93_v18 = vld [vmem:[#allocation5 + $0x60] sm:$0xff]  ;;  %v94_v19 = vld [vmem:[#allocation5 + $0x68] sm:$0xff] }
  0x1b   :  { %122 = vmatpush.msra.mxu0 %v105_v6  ;;  %142 = vmatpush.msra.mxu1 %v106_v7  ;;  %v91_v20 = vld [vmem:[#allocation5 + $0x50] sm:$0xff]  ;;  %v92_v21 = vld [vmem:[#allocation5 + $0x58] sm:$0xff]  ;;  %v89_v22 = vld [vmem:[#allocation5 + $0x40] sm:$0xff] }
  0x1c   :  { %v90_v23 = vld [vmem:[#allocation5 + $0x48] sm:$0xff]  ;;  %v87_v24 = vld [vmem:[#allocation5 + $0x30] sm:$0xff]  ;;  %v88_v25 = vld [vmem:[#allocation5 + $0x38] sm:$0xff] }
  0x1d   :  { %123 = vmatpush.msra.mxu0 %v103_v8  ;;  %143 = vmatpush.msra.mxu1 %v104_v9  ;;  %v85_v26 = vld [vmem:[#allocation5 + $0x20] sm:$0xff]  ;;  %v86_v27 = vld [vmem:[#allocation5 + $0x28] sm:$0xff]  ;;  %v83_v28 = vld [vmem:[#allocation5 + $0x10] sm:$0xff] }
  0x1e   :  { %v84_v29 = vld [vmem:[#allocation5 + $0x18] sm:$0xff]  ;;  %v81_v30 = vld [vmem:[#allocation5] sm:$0xff]  ;;  %v82_v31 = vld [vmem:[#allocation5 + $0x8] sm:$0xff] }
  0x1f   :  { %124 = vmatpush.msra.mxu0 %v101_v10  ;;  %144 = vmatpush.msra.mxu1 %v102_v11  ;;  %v80_v32 = vld [vmem:[#allocation2] sm:$0xf]  ;;  %v231_v35 = vld [vmem:[#allocation8 + $0x70] sm:$0xff]  ;;  %v230_v37 = vld [vmem:[#allocation8 + $0x68] sm:$0xff] }
  0x20   :  { %v232_v33 = vld [vmem:[#allocation8 + $0x78] sm:$0xff]  ;;  %v247_v36 = vld [vmem:[#allocation8 + $0xf0] sm:$0xff]  ;;  %v246_v38 = vld [vmem:[#allocation8 + $0xe8] sm:$0xff] }
  0x21   :  { %125 = vmatpush.msra.mxu0 %v99_v12  ;;  %145 = vmatpush.msra.mxu1 %v100_v13  ;;  %v248_v34 = vld [vmem:[#allocation8 + $0xf8] sm:$0xff]  ;;  %v229_v39 = vld [vmem:[#allocation8 + $0x60] sm:$0xff]  ;;  %v227_v46 = vld [vmem:[#allocation8 + $0x50] sm:$0xff] }
  0x22   :  { %253 = vmatpush.msra.mxu2 %v232_v33  ;;  %273 = vmatpush.msra.mxu3 %v248_v34  ;;  %v245_v40 = vld [vmem:[#allocation8 + $0xe0] sm:$0xff]  ;;  %v113_v41 = vld [vmem:[#allocation7] sm:$0x3]  ;;  %v243_v47 = vld [vmem:[#allocation8 + $0xd0] sm:$0xff] }
  0x23   :  { %126 = vmatpush.msra.mxu0 %v97_v14  ;;  %146 = vmatpush.msra.mxu1 %v98_v15  ;;  %v228_v42 = vld [vmem:[#allocation8 + $0x58] sm:$0xff]  ;;  %v115_v44 = vperm.slane %v113_v41, 0  ;;  %v116_v45 = vperm.slane %v113_v41, 1  ;;  %v226_v48 = vld [vmem:[#allocation8 + $0x48] sm:$0xff]  ;;  %v225_v54 = vld [vmem:[#allocation8 + $0x40] sm:$0xff] }
  0x24   :  { %254 = vmatpush.msra.mxu2 %v231_v35  ;;  %274 = vmatpush.msra.mxu3 %v247_v36  ;;  %v244_v43 = vld [vmem:[#allocation8 + $0xd8] sm:$0xff]  ;;  %v242_v49 = vld [vmem:[#allocation8 + $0xc8] sm:$0xff]  ;;  %v241_v55 = vld [vmem:[#allocation8 + $0xc0] sm:$0xff] }
  0x25   :  { %127 = vmatpush.msra.mxu0 %v95_v16  ;;  %147 = vmatpush.msra.mxu1 %v96_v17  ;;  %v224_v58 = vld [vmem:[#allocation8 + $0x38] sm:$0xff]  ;;  %v223_v62 = vld [vmem:[#allocation8 + $0x30] sm:$0xff]  ;;  %v222_v2 = vld [vmem:[#allocation8 + $0x28] sm:$0xff] }
  0x26   :  { %255 = vmatpush.msra.mxu2 %v230_v37  ;;  %275 = vmatpush.msra.mxu3 %v246_v38  ;;  %v240_v59 = vld [vmem:[#allocation8 + $0xb8] sm:$0xff]  ;;  %v239_v63 = vld [vmem:[#allocation8 + $0xb0] sm:$0xff]  ;;  %v238_v3 = vld [vmem:[#allocation8 + $0xa8] sm:$0xff] }
  0x27   :  { %128 = vmatpush.msra.mxu0 %v93_v18  ;;  %148 = vmatpush.msra.mxu1 %v94_v19  ;;  %v221_v6 = vld [vmem:[#allocation8 + $0x20] sm:$0xff]  ;;  %v220_v8 = vld [vmem:[#allocation8 + $0x18] sm:$0xff]  ;;  %v219_v10 = vld [vmem:[#allocation8 + $0x10] sm:$0xff] }
  0x28   :  { %256 = vmatpush.msra.mxu2 %v229_v39  ;;  %276 = vmatpush.msra.mxu3 %v245_v40  ;;  %v237_v7 = vld [vmem:[#allocation8 + $0xa0] sm:$0xff]  ;;  %v236_v9 = vld [vmem:[#allocation8 + $0x98] sm:$0xff]  ;;  %v235_v11 = vld [vmem:[#allocation8 + $0x90] sm:$0xff] }
  0x29   :  { %129 = vmatpush.msra.mxu0 %v91_v20  ;;  %149 = vmatpush.msra.mxu1 %v92_v21  ;;  %v218_v12 = vld [vmem:[#allocation8 + $0x8] sm:$0xff]  ;;  %v217_v15 = vld [vmem:[#allocation8] sm:$0xff] }
  0x2a   :  { %257 = vmatpush.msra.mxu2 %v228_v42  ;;  %277 = vmatpush.msra.mxu3 %v244_v43  ;;  %v234_v13 = vld [vmem:[#allocation8 + $0x88] sm:$0xff]  ;;  %v233_v16 = vld [vmem:[#allocation8 + $0x80] sm:$0xff] }
  0x2b   :  { %130 = vmatpush.msra.mxu0 %v89_v22  ;;  %150 = vmatpush.msra.mxu1 %v90_v23 }
  0x2c   :  { %258 = vmatpush.msra.mxu2 %v227_v46  ;;  %278 = vmatpush.msra.mxu3 %v243_v47 }
  0x2d   :  { %131 = vmatpush.msra.mxu0 %v87_v24  ;;  %151 = vmatpush.msra.mxu1 %v88_v25 }
  0x2e   :  { %259 = vmatpush.msra.mxu2 %v226_v48  ;;  %279 = vmatpush.msra.mxu3 %v242_v49 }
  0x2f   :  { %132 = vmatpush.msra.mxu0 %v85_v26  ;;  %152 = vmatpush.msra.mxu1 %v86_v27 }
  0x30   :  { %260 = vmatpush.msra.mxu2 %v225_v54  ;;  %280 = vmatpush.msra.mxu3 %v241_v55  ;;  %v501_v55 = vmov -1.0  }
  0x31   :  { %133 = vmatpush.msra.mxu0 %v83_v28  ;;  %153 = vmatpush.msra.mxu1 %v84_v29 }
  0x32   :  { %261 = vmatpush.msra.mxu2 %v224_v58  ;;  %281 = vmatpush.msra.mxu3 %v240_v59 }
  0x33   :  { %134 = vmatpush.msra.mxu0 %v81_v30  ;;  %154 = vmatpush.msra.mxu1 %v82_v31 }
  0x34   :  { %135 = vmatmul.f32.vlgmr.msra.gmra.mxu0 %v80_v32  ;;  %155 = vmatmul.f32.vlgmr.msra.gmra.mxu1 %v80_v32 }
  0x35   :  { %262 = vmatpush.msra.mxu2 %v223_v62  ;;  %282 = vmatpush.msra.mxu3 %v239_v63 }
  0x37   :  { %263 = vmatpush.msra.mxu2 %v222_v2  ;;  %283 = vmatpush.msra.mxu3 %v238_v3 }
  0x39   :  { %264 = vmatpush.msra.mxu2 %v221_v6  ;;  %284 = vmatpush.msra.mxu3 %v237_v7 }
  0x3b   :  { %265 = vmatpush.msra.mxu2 %v220_v8  ;;  %285 = vmatpush.msra.mxu3 %v236_v9 }
  0x3d   :  { %266 = vmatpush.msra.mxu2 %v219_v10  ;;  %286 = vmatpush.msra.mxu3 %v235_v11 }
  0x3f   :  { %267 = vmatpush.msra.mxu2 %v218_v12  ;;  %287 = vmatpush.msra.mxu3 %v234_v13 }
  0x41   :  { %268 = vmatpush.msra.mxu2 %v217_v15  ;;  %288 = vmatpush.msra.mxu3 %v233_v16 }
  0xb1   :  { %v136_v50 = vpop.f32.mrf.mxu0  ;;  %v156_v51 = vpop.f32.mrf.mxu1 }
  0xb2   :  { %v545_v52 = vadd.f32 %v136_v50, %v115_v44  ;;  %v547_v53 = vadd.f32 %v156_v51, %v116_v45 }
  0xb4   :  { %v550_v56 = vmul.f32 0.70710677, %v545_v52  ;;  %v553_v57 = vmul.f32 0.70710677, %v547_v53  ;;  %v159_v63 = vmul.f32 0.5, %v545_v52 }
  0xb6   :  { %v167_v60 = vand.u32 2147483647, %v550_v56  ;;  %v168_v61 = vand.u32 2147483647, %v553_v57  ;;  %vm163_vm0 = vcmp.ge.f32.partialorder %v550_v56, 0.0  ;;  %vm164_vm1 = vcmp.ge.f32.partialorder %v553_v57, 0.0 }
  0xb7   :  { %v165_v58 = vsel %vm163_vm0, 1.0, %v501_v55  ;;  %v352_v56 = vld [vmem:[%s571_s4] ss:$0 sm:$0xff]  ;;  %s502_s4 = smov [#allocation10]  }
  0xb8   :  { %v169_v0 = vmul.f32 0.3275911, %v167_v60  ;;  %v170_v1 = vmul.f32 0.3275911, %v168_v61  ;;  %v199_v23 = vsub.f32 0.0, %v167_v60  ;;  %v200_v25 = vsub.f32 0.0, %v168_v61 }
  0xb9   :  { %s328_s15 = sshll.u32 %s502_s4, 4  ;;  %s329_s15 = int_to_ptr.vmem [resolvable:$true] %s328_s15 }
  0xba   :  { %v171_v4 = vadd.f32 1.0, %v169_v0  ;;  %v172_v5 = vadd.f32 1.0, %v170_v1  ;;  %v201_v29 = vmul.f32 %v199_v23, %v167_v60  ;;  %v202_v31 = vmul.f32 %v200_v25, %v168_v61 }
  0xbb   :  { %v166_v61 = vsel %vm164_vm1, 1.0, %v501_v55  ;;  %v160_v1 = vmul.f32 0.5, %v547_v53 }
  0xbc   :  { %353 = vrcp.f32 %v171_v4  ;;  %v203_v35 = vmul.f32 1.442695, %v201_v29  ;;  %v205_v37 = vmul.f32 1.442695, %v202_v31 }
  0xbd   :  { %355 = vrcp.f32 %v172_v5 }
  0xbe   :  { %357 = vpow2.f32 %v203_v35 }
  0xbf   :  { %359 = vpow2.f32 %v205_v37 }
  0xc2   :  { %v354_v14 = vpop.eup %353 }
  0xc3   :  { %v356_v17 = vpop.eup %355  ;;  %v175_v18 = vmul.f32 %v354_v14, %v171_v4 }
  0xc4   :  { %v176_v19 = vmul.f32 %v356_v17, %v172_v5  ;;  %v358_v47 = vpop.eup %357 }
  0xc5   :  { %v177_v20 = vsub.f32 2.0, %v175_v18  ;;  %v360_v49 = vpop.eup %359 }
  0xc6   :  { %v178_v21 = vsub.f32 2.0, %v176_v19 }
  0xc7   :  { %v179_v22 = vmul.f32 %v354_v14, %v177_v20 }
  0xc8   :  { %v180_v24 = vmul.f32 %v356_v17, %v178_v21 }
  0xc9   :  { %v181_v26 = vmul.f32 1.0614054, %v179_v22 }
  0xca   :  { %v182_v27 = vmul.f32 1.0614054, %v180_v24 }
  0xcb   :  { %v183_v28 = vadd.f32 -1.4531521, %v181_v26 }
  0xcc   :  { %v184_v30 = vadd.f32 -1.4531521, %v182_v27 }
  0xcd   :  { %v185_v32 = vmul.f32 %v183_v28, %v179_v22 }
  0xce   :  { %v186_v33 = vmul.f32 %v184_v30, %v180_v24 }
  0xcf   :  { %v187_v34 = vadd.f32 1.4214138, %v185_v32 }
  0xd0   :  { %v188_v36 = vadd.f32 1.4214138, %v186_v33 }
  0xd1   :  { %v189_v38 = vmul.f32 %v187_v34, %v179_v22 }
  0xd2   :  { %v190_v39 = vmul.f32 %v188_v36, %v180_v24 }
  0xd3   :  { %v191_v40 = vadd.f32 -0.28449672, %v189_v38 }
  0xd4   :  { %v192_v41 = vadd.f32 -0.28449672, %v190_v39 }
  0xd5   :  { %v193_v42 = vmul.f32 %v191_v40, %v179_v22 }
  0xd6   :  { %v194_v43 = vmul.f32 %v192_v41, %v180_v24 }
  0xd7   :  { %v195_v44 = vadd.f32 0.2548296, %v193_v42 }
  0xd8   :  { %v196_v45 = vadd.f32 0.2548296, %v194_v43 }
  0xd9   :  { %v197_v46 = vmul.f32 %v195_v44, %v179_v22 }
  0xda   :  { %v198_v48 = vmul.f32 %v196_v45, %v180_v24 }
  0xdb   :  { %v207_v50 = vmul.f32 %v358_v47, %v197_v46 }
  0xdc   :  { %v208_v51 = vmul.f32 %v360_v49, %v198_v48 }
  0xdd   :  { %v209_v54 = vsub.f32 1.0, %v207_v50 }
  0xde   :  { %v210_v59 = vsub.f32 1.0, %v208_v51 }
  0xdf   :  { %v211_v60 = vmul.f32 %v209_v54, %v165_v58 }
  0xe0   :  { %v212_v62 = vmul.f32 %v210_v59, %v166_v61 }
  0xe1   :  { %v213_v0 = vadd.f32 1.0, %v211_v60 }
  0xe2   :  { %v214_v2 = vadd.f32 1.0, %v212_v62 }
  0xe3   :  { %v215_v3 = vmul.f32 %v213_v0, %v159_v63 }
  0xe4   :  { %v216_v4 = vmul.f32 %v214_v2, %v160_v1 }
  0xe5   :  { %269 = vmatmul.f32.vlgmr.msra.gmra.mxu2 %v215_v3 }
  0xe6   :  { %289 = vmatmul.f32.vlgmr.msra.gmra.mxu3 %v216_v4 }
 0x168   :  { %v270_v57 = vpop.f32.mrf.mxu2 }
 0x169   :  { %v271_v5 = vadd.f32 %v352_v56, %v270_v57  ;;  %v290_v6 = vpop.f32.mrf.mxu3 }
 0x16b   :  { %v291_v7 = vadd.f32 %v290_v6, %v271_v5 }
 0x16d   :  { %v294_v8 = vmul.f32 0.70710677, %v291_v7  ;;  %v293_v31 = vmul.f32 0.5, %v291_v7 }
 0x16f   :  { %v297_v9 = vand.u32 2147483647, %v294_v8  ;;  %vm295_vm2 = vcmp.ge.f32.partialorder %v294_v8, 0.0 }
 0x170   :  { %v296_v29 = vsel %vm295_vm2, 1.0, %v501_v55 }
 0x171   :  { %v298_v10 = vmul.f32 0.3275911, %v297_v9  ;;  %v313_v14 = vsub.f32 0.0, %v297_v9 }
 0x173   :  { %v299_v52 = vadd.f32 1.0, %v298_v10  ;;  %v314_v17 = vmul.f32 %v313_v14, %v297_v9 }
 0x175   :  { %361 = vrcp.f32 %v299_v52  ;;  %v315_v20 = vmul.f32 1.442695, %v314_v17 }
 0x177   :  { %363 = vpow2.f32 %v315_v20 }
 0x17b   :  { %v362_v11 = vpop.eup %361 }
 0x17c   :  { %v301_v53 = vmul.f32 %v362_v11, %v299_v52 }
 0x17d   :  { %v364_v26 = vpop.eup %363 }
 0x17e   :  { %v302_v12 = vsub.f32 2.0, %v301_v53 }
 0x180   :  { %v303_v13 = vmul.f32 %v362_v11, %v302_v12 }
 0x182   :  { %v304_v15 = vmul.f32 1.0614054, %v303_v13 }
 0x184   :  { %v305_v16 = vadd.f32 -1.4531521, %v304_v15 }
 0x186   :  { %v306_v18 = vmul.f32 %v305_v16, %v303_v13 }
 0x188   :  { %v307_v19 = vadd.f32 1.4214138, %v306_v18 }
 0x18a   :  { %v308_v21 = vmul.f32 %v307_v19, %v303_v13 }
 0x18c   :  { %v309_v22 = vadd.f32 -0.28449672, %v308_v21 }
 0x18e   :  { %v310_v23 = vmul.f32 %v309_v22, %v303_v13 }
 0x190   :  { %v311_v24 = vadd.f32 0.2548296, %v310_v23 }
 0x192   :  { %v312_v25 = vmul.f32 %v311_v24, %v303_v13 }
 0x194   :  { %v317_v27 = vmul.f32 %v364_v26, %v312_v25 }
 0x196   :  { %v318_v28 = vsub.f32 1.0, %v317_v27 }
 0x198   :  { %v319_v30 = vmul.f32 %v318_v28, %v296_v29 }
 0x19a   :  { %v320_v32 = vadd.f32 1.0, %v319_v30 }
 0x19c   :  { %v321_v33 = vmul.f32 %v320_v32, %v293_v31 }
 0x19e   :  { %322 = vst [vmem:[#allocation10] sm:$0xf] %v321_v33 }
 0x19f   :  { %333 = dma.vmem_to_hbm [thread:$0]  %s329_s15, 64, %s331_s18, [#allocation4]  }
 0x1a0   :  { %491 = dma.done.wait [#allocation4], 64  }
 0x1a1   :  { %492 = vsyncadd [#allocation4], 4294967232 }
 0x1a2   :  { %338 = vsyncpa [#allocation3], 1 }
 0x1a3   :  { %339 = vsyncpa [#allocation6], 1 }
 0x1a4   :  { %340 = vsyncpa [#allocation9], 1 }
 0x1a5   :  { %341 = vsyncpa [#allocation4], 1 }

// kernel: tpu_custom_call.1
= control target key start
LH: loop header
LB: loop body
LE: loop exit
PB: predicated region body
PF: predicated region fallthrough
CT: control target
= control target key end

     0   :  { %10 = vsyncpa [#allocation3], 0  ;;  %s567_s0 = inlined_call_operand.hbm [shape: f32[4,128], index: 0, kind: input, shape index: {}]   ;;  %s568_s1 = inlined_call_operand.hbm [shape: f32[128,256], index: 1, kind: input, shape index: {}]   ;;  %s569_s2 = inlined_call_operand.hbm [shape: f32[1,256], index: 2, kind: input, shape index: {}]   ;;  %s570_s3 = inlined_call_operand.hbm [shape: f32[256,128], index: 3, kind: input, shape index: {}]   ;;  %s571_s4 = inlined_call_operand.vmem [shape: f32[1,128], index: 4, kind: input, shape index: {}]   ;;  %s572_s5 = inlined_call_operand.hbm [shape: f32[4,128], index: 5, kind: output, shape index: {}]  }
   0x1   :  { %11 = vsyncpa [#allocation6], 0 }
   0x2   :  { %12 = vsyncpa [#allocation9], 0  ;;  %s29_s20 = sshll.u32 %s568_s1, 4  ;;  %s30_s20 = int_to_ptr.hbm [resolvable:$true] %s29_s20 }
   0x3   :  { %13 = vsyncpa [#allocation4], 0  ;;  %s493_s21 = smov [#allocation5]   ;;  %s19_s25 = sshll.u32 %s567_s0, 4  ;;  %s20_s25 = int_to_ptr.hbm [resolvable:$true] %s19_s25 }
   0x4   :  { %s31_s22 = sshll.u32 %s493_s21, 4  ;;  %s494_s26 = smov 256   ;;  %s32_s22 = int_to_ptr.vmem [resolvable:$true] %s31_s22 }
   0x5   :  { %s495_s27 = smov 16   ;;  %s496_s28 = smov [#allocation2]  }
   0x6   :  { %37 = dma.hbm_to_vmem [thread:$0]  %s30_s20, 4096, %s32_s22, [#allocation6], %s494_s26, %s494_s26, %s495_s27  }
   0x7   :  { %s21_s29 = sshll.u32 %s496_s28, 4  ;;  %s43_s7 = sshll.u32 %s569_s2, 4  ;;  %s22_s29 = int_to_ptr.vmem [resolvable:$true] %s21_s29  ;;  %s44_s7 = int_to_ptr.hbm [resolvable:$true] %s43_s7 }
   0x8   :  { %24 = dma.hbm_to_vmem [thread:$0]  %s20_s25, 64, %s22_s29, [#allocation3]  }
   0x9   :  { %s53_s9 = sshll.u32 %s570_s3, 4  ;;  %s497_s10 = smov [#allocation7]   ;;  %s54_s9 = int_to_ptr.hbm [resolvable:$true] %s53_s9 }
   0xa   :  { %s45_s11 = sshll.u32 %s497_s10, 4  ;;  %s498_s0 = smov [#allocation8]   ;;  %s46_s11 = int_to_ptr.vmem [resolvable:$true] %s45_s11 }
   0xb   :  { %48 = dma.hbm_to_vmem [thread:$0]  %s44_s7, 32, %s46_s11, [#allocation6]  }
   0xc   :  { %s55_s12 = sshll.u32 %s498_s0, 4  ;;  %s499_s13 = smov 128   ;;  %s56_s12 = int_to_ptr.vmem [resolvable:$true] %s55_s12 }
   0xd   :  { %s500_s14 = smov 8  }
   0xe   :  { %61 = dma.hbm_to_vmem [thread:$0]  %s54_s9, 4096, %s56_s12, [#allocation9], %s499_s13, %s499_s13, %s500_s14  }
   0xf   :  { %485 = dma.done.wait [#allocation3], 64  }
  0x10   :  { %486 = vsyncadd [#allocation3], 4294967232 }
  0x11   :  { %487 = dma.done.wait [#allocation6], 4128  }
  0x12   :  { %488 = vsyncadd [#allocation6], 4294963168 }
  0x13   :  { %489 = dma.done.wait [#allocation9], 4096  }
  0x14   :  { %490 = vsyncadd [#allocation9], 4294963200  ;;  %v111_v0 = vld [vmem:[#allocation5 + $0xf0] sm:$0xff]  ;;  %v112_v1 = vld [vmem:[#allocation5 + $0xf8] sm:$0xff]  ;;  %s330_s18 = sshll.u32 %s572_s5, 4  ;;  %s331_s18 = int_to_ptr.hbm [resolvable:$true] %s330_s18 }
  0x15   :  { %v109_v2 = vld [vmem:[#allocation5 + $0xe0] sm:$0xff]  ;;  %119 = vmatpush.msra.mxu0 %v111_v0  ;;  %139 = vmatpush.msra.mxu1 %v112_v1  ;;  %v110_v3 = vld [vmem:[#allocation5 + $0xe8] sm:$0xff]  ;;  %v107_v4 = vld [vmem:[#allocation5 + $0xd0] sm:$0xff] }
  0x16   :  { %v108_v5 = vld [vmem:[#allocation5 + $0xd8] sm:$0xff]  ;;  %v105_v6 = vld [vmem:[#allocation5 + $0xc0] sm:$0xff]  ;;  %v106_v7 = vld [vmem:[#allocation5 + $0xc8] sm:$0xff] }
  0x17   :  { %120 = vmatpush.msra.mxu0 %v109_v2  ;;  %140 = vmatpush.msra.mxu1 %v110_v3  ;;  %v103_v8 = vld [vmem:[#allocation5 + $0xb0] sm:$0xff]  ;;  %v104_v9 = vld [vmem:[#allocation5 + $0xb8] sm:$0xff]  ;;  %v101_v10 = vld [vmem:[#allocation5 + $0xa0] sm:$0xff] }
  0x18   :  { %v102_v11 = vld [vmem:[#allocation5 + $0xa8] sm:$0xff]  ;;  %v99_v12 = vld [vmem:[#allocation5 + $0x90] sm:$0xff]  ;;  %v100_v13 = vld [vmem:[#allocation5 + $0x98] sm:$0xff] }
  0x19   :  { %121 = vmatpush.msra.mxu0 %v107_v4  ;;  %141 = vmatpush.msra.mxu1 %v108_v5  ;;  %v97_v14 = vld [vmem:[#allocation5 + $0x80] sm:$0xff]  ;;  %v98_v15 = vld [vmem:[#allocation5 + $0x88] sm:$0xff]  ;;  %v95_v16 = vld [vmem:[#allocation5 + $0x70] sm:$0xff] }
  0x1a   :  { %v96_v17 = vld [vmem:[#allocation5 + $0x78] sm:$0xff]  ;;  %v93_v18 = vld [vmem:[#allocation5 + $0x60] sm:$0xff]  ;;  %v94_v19 = vld [vmem:[#allocation5 + $0x68] sm:$0xff] }
  0x1b   :  { %122 = vmatpush.msra.mxu0 %v105_v6  ;;  %142 = vmatpush.msra.mxu1 %v106_v7  ;;  %v91_v20 = vld [vmem:[#allocation5 + $0x50] sm:$0xff]  ;;  %v92_v21 = vld [vmem:[#allocation5 + $0x58] sm:$0xff]  ;;  %v89_v22 = vld [vmem:[#allocation5 + $0x40] sm:$0xff] }
  0x1c   :  { %v90_v23 = vld [vmem:[#allocation5 + $0x48] sm:$0xff]  ;;  %v87_v24 = vld [vmem:[#allocation5 + $0x30] sm:$0xff]  ;;  %v88_v25 = vld [vmem:[#allocation5 + $0x38] sm:$0xff] }
  0x1d   :  { %123 = vmatpush.msra.mxu0 %v103_v8  ;;  %143 = vmatpush.msra.mxu1 %v104_v9  ;;  %v85_v26 = vld [vmem:[#allocation5 + $0x20] sm:$0xff]  ;;  %v86_v27 = vld [vmem:[#allocation5 + $0x28] sm:$0xff]  ;;  %v83_v28 = vld [vmem:[#allocation5 + $0x10] sm:$0xff] }
  0x1e   :  { %v84_v29 = vld [vmem:[#allocation5 + $0x18] sm:$0xff]  ;;  %v81_v30 = vld [vmem:[#allocation5] sm:$0xff]  ;;  %v82_v31 = vld [vmem:[#allocation5 + $0x8] sm:$0xff] }
  0x1f   :  { %124 = vmatpush.msra.mxu0 %v101_v10  ;;  %144 = vmatpush.msra.mxu1 %v102_v11  ;;  %v80_v32 = vld [vmem:[#allocation2] sm:$0xf]  ;;  %v231_v35 = vld [vmem:[#allocation8 + $0x70] sm:$0xff]  ;;  %v230_v37 = vld [vmem:[#allocation8 + $0x68] sm:$0xff] }
  0x20   :  { %v232_v33 = vld [vmem:[#allocation8 + $0x78] sm:$0xff]  ;;  %v247_v36 = vld [vmem:[#allocation8 + $0xf0] sm:$0xff]  ;;  %v246_v38 = vld [vmem:[#allocation8 + $0xe8] sm:$0xff] }
  0x21   :  { %125 = vmatpush.msra.mxu0 %v99_v12  ;;  %145 = vmatpush.msra.mxu1 %v100_v13  ;;  %v248_v34 = vld [vmem:[#allocation8 + $0xf8] sm:$0xff]  ;;  %v229_v39 = vld [vmem:[#allocation8 + $0x60] sm:$0xff]  ;;  %v227_v46 = vld [vmem:[#allocation8 + $0x50] sm:$0xff] }
  0x22   :  { %253 = vmatpush.msra.mxu2 %v232_v33  ;;  %273 = vmatpush.msra.mxu3 %v248_v34  ;;  %v245_v40 = vld [vmem:[#allocation8 + $0xe0] sm:$0xff]  ;;  %v113_v41 = vld [vmem:[#allocation7] sm:$0x3]  ;;  %v243_v47 = vld [vmem:[#allocation8 + $0xd0] sm:$0xff] }
  0x23   :  { %126 = vmatpush.msra.mxu0 %v97_v14  ;;  %146 = vmatpush.msra.mxu1 %v98_v15  ;;  %v228_v42 = vld [vmem:[#allocation8 + $0x58] sm:$0xff]  ;;  %v115_v44 = vperm.slane %v113_v41, 0  ;;  %v116_v45 = vperm.slane %v113_v41, 1  ;;  %v226_v48 = vld [vmem:[#allocation8 + $0x48] sm:$0xff]  ;;  %v225_v54 = vld [vmem:[#allocation8 + $0x40] sm:$0xff] }
  0x24   :  { %254 = vmatpush.msra.mxu2 %v231_v35  ;;  %274 = vmatpush.msra.mxu3 %v247_v36  ;;  %v244_v43 = vld [vmem:[#allocation8 + $0xd8] sm:$0xff]  ;;  %v242_v49 = vld [vmem:[#allocation8 + $0xc8] sm:$0xff]  ;;  %v241_v55 = vld [vmem:[#allocation8 + $0xc0] sm:$0xff] }
  0x25   :  { %127 = vmatpush.msra.mxu0 %v95_v16  ;;  %147 = vmatpush.msra.mxu1 %v96_v17  ;;  %v224_v58 = vld [vmem:[#allocation8 + $0x38] sm:$0xff]  ;;  %v223_v62 = vld [vmem:[#allocation8 + $0x30] sm:$0xff]  ;;  %v222_v2 = vld [vmem:[#allocation8 + $0x28] sm:$0xff] }
  0x26   :  { %255 = vmatpush.msra.mxu2 %v230_v37  ;;  %275 = vmatpush.msra.mxu3 %v246_v38  ;;  %v240_v59 = vld [vmem:[#allocation8 + $0xb8] sm:$0xff]  ;;  %v239_v63 = vld [vmem:[#allocation8 + $0xb0] sm:$0xff]  ;;  %v238_v3 = vld [vmem:[#allocation8 + $0xa8] sm:$0xff] }
  0x27   :  { %128 = vmatpush.msra.mxu0 %v93_v18  ;;  %148 = vmatpush.msra.mxu1 %v94_v19  ;;  %v221_v6 = vld [vmem:[#allocation8 + $0x20] sm:$0xff]  ;;  %v220_v8 = vld [vmem:[#allocation8 + $0x18] sm:$0xff]  ;;  %v219_v10 = vld [vmem:[#allocation8 + $0x10] sm:$0xff] }
  0x28   :  { %256 = vmatpush.msra.mxu2 %v229_v39  ;;  %276 = vmatpush.msra.mxu3 %v245_v40  ;;  %v237_v7 = vld [vmem:[#allocation8 + $0xa0] sm:$0xff]  ;;  %v236_v9 = vld [vmem:[#allocation8 + $0x98] sm:$0xff]  ;;  %v235_v11 = vld [vmem:[#allocation8 + $0x90] sm:$0xff] }
  0x29   :  { %129 = vmatpush.msra.mxu0 %v91_v20  ;;  %149 = vmatpush.msra.mxu1 %v92_v21  ;;  %v218_v12 = vld [vmem:[#allocation8 + $0x8] sm:$0xff]  ;;  %v217_v15 = vld [vmem:[#allocation8] sm:$0xff] }
  0x2a   :  { %257 = vmatpush.msra.mxu2 %v228_v42  ;;  %277 = vmatpush.msra.mxu3 %v244_v43  ;;  %v234_v13 = vld [vmem:[#allocation8 + $0x88] sm:$0xff]  ;;  %v233_v16 = vld [vmem:[#allocation8 + $0x80] sm:$0xff] }
  0x2b   :  { %130 = vmatpush.msra.mxu0 %v89_v22  ;;  %150 = vmatpush.msra.mxu1 %v90_v23 }
  0x2c   :  { %258 = vmatpush.msra.mxu2 %v227_v46  ;;  %278 = vmatpush.msra.mxu3 %v243_v47 }
  0x2d   :  { %131 = vmatpush.msra.mxu0 %v87_v24  ;;  %151 = vmatpush.msra.mxu1 %v88_v25 }
  0x2e   :  { %259 = vmatpush.msra.mxu2 %v226_v48  ;;  %279 = vmatpush.msra.mxu3 %v242_v49 }
  0x2f   :  { %132 = vmatpush.msra.mxu0 %v85_v26  ;;  %152 = vmatpush.msra.mxu1 %v86_v27 }
  0x30   :  { %260 = vmatpush.msra.mxu2 %v225_v54  ;;  %280 = vmatpush.msra.mxu3 %v241_v55  ;;  %v501_v55 = vmov -1.0  }
  0x31   :  { %133 = vmatpush.msra.mxu0 %v83_v28  ;;  %153 = vmatpush.msra.mxu1 %v84_v29 }
  0x32   :  { %261 = vmatpush.msra.mxu2 %v224_v58  ;;  %281 = vmatpush.msra.mxu3 %v240_v59 }
  0x33   :  { %134 = vmatpush.msra.mxu0 %v81_v30  ;;  %154 = vmatpush.msra.mxu1 %v82_v31 }
  0x34   :  { %135 = vmatmul.f32.vlgmr.msra.gmra.mxu0 %v80_v32  ;;  %155 = vmatmul.f32.vlgmr.msra.gmra.mxu1 %v80_v32 }
  0x35   :  { %262 = vmatpush.msra.mxu2 %v223_v62  ;;  %282 = vmatpush.msra.mxu3 %v239_v63 }
  0x37   :  { %263 = vmatpush.msra.mxu2 %v222_v2  ;;  %283 = vmatpush.msra.mxu3 %v238_v3 }
  0x39   :  { %264 = vmatpush.msra.mxu2 %v221_v6  ;;  %284 = vmatpush.msra.mxu3 %v237_v7 }
  0x3b   :  { %265 = vmatpush.msra.mxu2 %v220_v8  ;;  %285 = vmatpush.msra.mxu3 %v236_v9 }
  0x3d   :  { %266 = vmatpush.msra.mxu2 %v219_v10  ;;  %286 = vmatpush.msra.mxu3 %v235_v11 }
  0x3f   :  { %267 = vmatpush.msra.mxu2 %v218_v12  ;;  %287 = vmatpush.msra.mxu3 %v234_v13 }
  0x41   :  { %268 = vmatpush.msra.mxu2 %v217_v15  ;;  %288 = vmatpush.msra.mxu3 %v233_v16 }
  0xb1   :  { %v136_v50 = vpop.f32.mrf.mxu0  ;;  %v156_v51 = vpop.f32.mrf.mxu1 }
  0xb2   :  { %v545_v52 = vadd.f32 %v136_v50, %v115_v44  ;;  %v547_v53 = vadd.f32 %v156_v51, %v116_v45 }
  0xb4   :  { %v550_v56 = vmul.f32 0.70710677, %v545_v52  ;;  %v553_v57 = vmul.f32 0.70710677, %v547_v53  ;;  %v159_v63 = vmul.f32 0.5, %v545_v52 }
  0xb6   :  { %v167_v60 = vand.u32 2147483647, %v550_v56  ;;  %v168_v61 = vand.u32 2147483647, %v553_v57  ;;  %vm163_vm0 = vcmp.ge.f32.partialorder %v550_v56, 0.0  ;;  %vm164_vm1 = vcmp.ge.f32.partialorder %v553_v57, 0.0 }
  0xb7   :  { %v165_v58 = vsel %vm163_vm0, 1.0, %v501_v55  ;;  %v352_v56 = vld [vmem:[%s571_s4] ss:$0 sm:$0xff]  ;;  %s502_s4 = smov [#allocation10]  }
  0xb8   :  { %v169_v0 = vmul.f32 0.3275911, %v167_v60  ;;  %v170_v1 = vmul.f32 0.3275911, %v168_v61  ;;  %v199_v23 = vsub.f32 0.0, %v167_v60  ;;  %v200_v25 = vsub.f32 0.0, %v168_v61 }
  0xb9   :  { %s328_s15 = sshll.u32 %s502_s4, 4  ;;  %s329_s15 = int_to_ptr.vmem [resolvable:$true] %s328_s15 }
  0xba   :  { %v171_v4 = vadd.f32 1.0, %v169_v0  ;;  %v172_v5 = vadd.f32 1.0, %v170_v1  ;;  %v201_v29 = vmul.f32 %v199_v23, %v167_v60  ;;  %v202_v31 = vmul.f32 %v200_v25, %v168_v61 }
  0xbb   :  { %v166_v61 = vsel %vm164_vm1, 1.0, %v501_v55  ;;  %v160_v1 = vmul.f32 0.5, %v547_v53 }
  0xbc   :  { %353 = vrcp.f32 %v171_v4  ;;  %v203_v35 = vmul.f32 1.442695, %v201_v29  ;;  %v205_v37 = vmul.f32 1.442695, %v202_v31 }
  0xbd   :  { %355 = vrcp.f32 %v172_v5 }
  0xbe   :  { %357 = vpow2.f32 %v203_v35 }
  0xbf   :  { %359 = vpow2.f32 %v205_v37 }
  0xc2   :  { %v354_v14 = vpop.eup %353 }
  0xc3   :  { %v356_v17 = vpop.eup %355  ;;  %v175_v18 = vmul.f32 %v354_v14, %v171_v4 }
  0xc4   :  { %v176_v19 = vmul.f32 %v356_v17, %v172_v5  ;;  %v358_v47 = vpop.eup %357 }
  0xc5   :  { %v177_v20 = vsub.f32 2.0, %v175_v18  ;;  %v360_v49 = vpop.eup %359 }
  0xc6   :  { %v178_v21 = vsub.f32 2.0, %v176_v19 }
  0xc7   :  { %v179_v22 = vmul.f32 %v354_v14, %v177_v20 }
  0xc8   :  { %v180_v24 = vmul.f32 %v356_v17, %v178_v21 }
  0xc9   :  { %v181_v26 = vmul.f32 1.0614054, %v179_v22 }
  0xca   :  { %v182_v27 = vmul.f32 1.0614054, %v180_v24 }
  0xcb   :  { %v183_v28 = vadd.f32 -1.4531521, %v181_v26 }
  0xcc   :  { %v184_v30 = vadd.f32 -1.4531521, %v182_v27 }
  0xcd   :  { %v185_v32 = vmul.f32 %v183_v28, %v179_v22 }
  0xce   :  { %v186_v33 = vmul.f32 %v184_v30, %v180_v24 }
  0xcf   :  { %v187_v34 = vadd.f32 1.4214138, %v185_v32 }
  0xd0   :  { %v188_v36 = vadd.f32 1.4214138, %v186_v33 }
  0xd1   :  { %v189_v38 = vmul.f32 %v187_v34, %v179_v22 }
  0xd2   :  { %v190_v39 = vmul.f32 %v188_v36, %v180_v24 }
  0xd3   :  { %v191_v40 = vadd.f32 -0.28449672, %v189_v38 }
  0xd4   :  { %v192_v41 = vadd.f32 -0.28449672, %v190_v39 }
  0xd5   :  { %v193_v42 = vmul.f32 %v191_v40, %v179_v22 }
  0xd6   :  { %v194_v43 = vmul.f32 %v192_v41, %v180_v24 }
  0xd7   :  { %v195_v44 = vadd.f32 0.2548296, %v193_v42 }
  0xd8   :  { %v196_v45 = vadd.f32 0.2548296, %v194_v43 }
  0xd9   :  { %v197_v46 = vmul.f32 %v195_v44, %v179_v22 }
  0xda   :  { %v198_v48 = vmul.f32 %v196_v45, %v180_v24 }
  0xdb   :  { %v207_v50 = vmul.f32 %v358_v47, %v197_v46 }
  0xdc   :  { %v208_v51 = vmul.f32 %v360_v49, %v198_v48 }
  0xdd   :  { %v209_v54 = vsub.f32 1.0, %v207_v50 }
  0xde   :  { %v210_v59 = vsub.f32 1.0, %v208_v51 }
  0xdf   :  { %v211_v60 = vmul.f32 %v209_v54, %v165_v58 }
  0xe0   :  { %v212_v62 = vmul.f32 %v210_v59, %v166_v61 }
  0xe1   :  { %v213_v0 = vadd.f32 1.0, %v211_v60 }
  0xe2   :  { %v214_v2 = vadd.f32 1.0, %v212_v62 }
  0xe3   :  { %v215_v3 = vmul.f32 %v213_v0, %v159_v63 }
  0xe4   :  { %v216_v4 = vmul.f32 %v214_v2, %v160_v1 }
  0xe5   :  { %269 = vmatmul.f32.vlgmr.msra.gmra.mxu2 %v215_v3 }
  0xe6   :  { %289 = vmatmul.f32.vlgmr.msra.gmra.mxu3 %v216_v4 }
 0x168   :  { %v270_v57 = vpop.f32.mrf.mxu2 }
 0x169   :  { %v271_v5 = vadd.f32 %v352_v56, %v270_v57  ;;  %v290_v6 = vpop.f32.mrf.mxu3 }
 0x16b   :  { %v291_v7 = vadd.f32 %v290_v6, %v271_v5 }
 0x16d   :  { %v294_v8 = vmul.f32 0.70710677, %v291_v7  ;;  %v293_v31 = vmul.f32 0.5, %v291_v7 }
 0x16f   :  { %v297_v9 = vand.u32 2147483647, %v294_v8  ;;  %vm295_vm2 = vcmp.ge.f32.partialorder %v294_v8, 0.0 }
 0x170   :  { %v296_v29 = vsel %vm295_vm2, 1.0, %v501_v55 }
 0x171   :  { %v298_v10 = vmul.f32 0.3275911, %v297_v9  ;;  %v313_v14 = vsub.f32 0.0, %v297_v9 }
 0x173   :  { %v299_v52 = vadd.f32 1.0, %v298_v10  ;;  %v314_v17 = vmul.f32 %v313_v14, %v297_v9 }
 0x175   :  { %361 = vrcp.f32 %v299_v52  ;;  %v315_v20 = vmul.f32 1.442695, %v314_v17 }
 0x177   :  { %363 = vpow2.f32 %v315_v20 }
 0x17b   :  { %v362_v11 = vpop.eup %361 }
 0x17c   :  { %v301_v53 = vmul.f32 %v362_v11, %v299_v52 }
 0x17d   :  { %v364_v26 = vpop.eup %363 }
 0x17e   :  { %v302_v12 = vsub.f32 2.0, %v301_v53 }
 0x180   :  { %v303_v13 = vmul.f32 %v362_v11, %v302_v12 }
 0x182   :  { %v304_v15 = vmul.f32 1.0614054, %v303_v13 }
 0x184   :  { %v305_v16 = vadd.f32 -1.4531521, %v304_v15 }
 0x186   :  { %v306_v18 = vmul.f32 %v305_v16, %v303_v13 }
 0x188   :  { %v307_v19 = vadd.f32 1.4214138, %v306_v18 }
 0x18a   :  { %v308_v21 = vmul.f32 %v307_v19, %v303_v13 }
 0x18c   :  { %v309_v22 = vadd.f32 -0.28449672, %v308_v21 }
 0x18e   :  { %v310_v23 = vmul.f32 %v309_v22, %v303_v13 }
 0x190   :  { %v311_v24 = vadd.f32 0.2548296, %v310_v23 }
 0x192   :  { %v312_v25 = vmul.f32 %v311_v24, %v303_v13 }
 0x194   :  { %v317_v27 = vmul.f32 %v364_v26, %v312_v25 }
 0x196   :  { %v318_v28 = vsub.f32 1.0, %v317_v27 }
 0x198   :  { %v319_v30 = vmul.f32 %v318_v28, %v296_v29 }
 0x19a   :  { %v320_v32 = vadd.f32 1.0, %v319_v30 }
 0x19c   :  { %v321_v33 = vmul.f32 %v320_v32, %v293_v31 }
 0x19e   :  { %322 = vst [vmem:[#allocation10] sm:$0xf] %v321_v33 }
 0x19f   :  { %333 = dma.vmem_to_hbm [thread:$0]  %s329_s15, 64, %s331_s18, [#allocation4]  }
 0x1a0   :  { %491 = dma.done.wait [#allocation4], 64  }
 0x1a1   :  { %492 = vsyncadd [#allocation4], 4294967232 }
 0x1a2   :  { %338 = vsyncpa [#allocation3], 1 }
 0x1a3   :  { %339 = vsyncpa [#allocation6], 1 }
 0x1a4   :  { %340 = vsyncpa [#allocation9], 1 }
 0x1a5   :  { %341 = vsyncpa [#allocation4], 1 }

</bundles_post_ra>
